<compile_context>
chip_gen: v5e
topology: v5e:2x2
jax: 0.10.0
libtpu: 0.0.40
codegen_flags: <defaults>
</compile_context>

<pallas_src>
import functools
import math

import jax
import jax.numpy as jnp
from jax import lax
from jax.experimental import pallas as pl
from jax.experimental.pallas import tpu as pltpu


# ------------------------------ Pallas kernel -------------------------------

def _cross_attention_kernel(num_heads, head_dim,
                            xq_ref, xkv_ref, m_ref,
                            wq_ref, wkv_ref, wp_ref, bp_ref,
                            o_ref):
    """One (batch row, query tile) per grid step; intermediates stay in VMEM.

    xq_ref : (1, tq, C)     query activations (f32)
    xkv_ref: (1, N,  C)     key/value activations (f32)
    m_ref  : (1, 1, tq, N)  additive mask tile (bf16, shared across heads)
    wq_ref : (C, C)         Q projection weights, softmax scale pre-folded (bf16)
    wkv_ref: (C, 2C)        K|V projection weights (bf16)
    wp_ref : (C, C)         output projection weights (bf16)
    bp_ref : (1, C)         output projection bias (f32)
    o_ref  : (1, tq, C)     lane-dense output tile
    """
    C = xq_ref.shape[2]
    Dh = head_dim

    xq = xq_ref[0].astype(jnp.bfloat16)       # (tq, C)
    xkv = xkv_ref[0].astype(jnp.bfloat16)     # (N, C)
    m = m_ref[0, 0].astype(jnp.float32)       # (tq, N) — mask math in f32

    # Full-width projections: contraction dim C, output width C / 2C, so the
    # MXU systolic array is actually filled (vs. H tiny Dh-wide matmuls).
    q_all = jnp.dot(xq, wq_ref[...], preferred_element_type=jnp.float32)     # (tq, C)
    kv_all = jnp.dot(xkv, wkv_ref[...], preferred_element_type=jnp.float32)  # (N, 2C)

    head_outs = []
    for h in range(num_heads):                # static unroll; H is small
        lo = h * Dh
        q_h = q_all[:, lo:lo + Dh].astype(jnp.bfloat16)            # (tq, Dh)
        k_h = kv_all[:, lo:lo + Dh].astype(jnp.bfloat16)           # (N,  Dh)
        v_h = kv_all[:, C + lo:C + lo + Dh].astype(jnp.bfloat16)   # (N,  Dh)

        # scores = q @ k^T via dot_general contracting the last dims — the MXU
        # consumes k directly, no XLU transpose.  Scale already folded into wq.
        s = lax.dot_general(q_h, k_h, (((1,), (1,)), ((), ())),
                            preferred_element_type=jnp.float32)    # (tq, N)
        s = s + m

        # numerically-stable softmax, exact normalization (f32 throughout).
        s = s - jnp.max(s, axis=-1, keepdims=True)
        p = jnp.exp(s)
        p = p / jnp.sum(p, axis=-1, keepdims=True)

        head_outs.append(jnp.dot(p.astype(jnp.bfloat16), v_h,
                                 preferred_element_type=jnp.float32))  # (tq, Dh)

    # Concatenate head outputs along lanes -> (tq, C), then a single full-width
    # output projection (contraction dim C) instead of H Dh-contractions.
    x = jnp.concatenate(head_outs, axis=-1).astype(jnp.bfloat16)
    out = jnp.dot(x, wp_ref[...], preferred_element_type=jnp.float32)
    out = out + bp_ref[...].astype(jnp.float32)
    o_ref[0] = out.astype(o_ref.dtype)


# ---------------------------- Module forward pass ----------------------------

def cross_attention_forward(q, kv, mask, params, num_heads):
    """q, kv: (B, N, C); mask: (B, 1, N, N) broadcast over heads."""
    B, N, C = q.shape
    H = num_heads
    Dh = C // H
    scale = Dh ** (-0.5)

    # Query tile: full N for short sequences, 128-row tiles for long ones.
    # TODO(synk): for very long N also stream K/V in tk-sized blocks with an
    #             online (flash-style) softmax so the resident score/mask tile
    #             shrinks from (tq, N) to (tq, tk).
    if N > 128 and N % 128 == 0:
        tq = 128
    else:
        tq = N
    n_q_tiles = N // tq

    # One-time weight prep (tiny, XLA side): fold the softmax scale into the Q
    # projection and cast weights to bf16 — MXU fast path + halved weight DMA.
    wq = (params["wq"] * scale).astype(jnp.bfloat16)            # (C, C)
    wkv = params["wkv"].astype(jnp.bfloat16)                    # (C, 2C)
    wp = params["wproj"].astype(jnp.bfloat16)                   # (C, C)
    bp = params["bproj"].reshape(1, C).astype(jnp.float32)      # (1, C)
    # bf16 mask: halves the largest per-step DMA (cast back to f32 in-kernel).
    mask_bf16 = mask.astype(jnp.bfloat16)

    def _nbytes(shape, dtype):
        return math.prod(shape) * jnp.dtype(dtype).itemsize

    # Explicit scoped-VMEM budget: double-buffered per-step blocks + weights,
    # plus headroom for compiler scratch; capped below v7x's 64 MiB physical.
    blk = (_nbytes((1, tq, C), q.dtype) + _nbytes((1, N, C), kv.dtype)
           + _nbytes((1, 1, tq, N), jnp.bfloat16) + _nbytes((1, tq, C), q.dtype))
    wts = (_nbytes((C, C), jnp.bfloat16) + _nbytes((C, 2 * C), jnp.bfloat16)
           + _nbytes((C, C), jnp.bfloat16) + _nbytes((1, C), jnp.float32))
    vmem_limit = int(min(max(3 * (blk + wts) + (8 << 20), 16 << 20), 48 << 20))

    grid_spec = pltpu.PrefetchScalarGridSpec(
        num_scalar_prefetch=0,
        grid=(B, n_q_tiles),
        in_specs=[
            pl.BlockSpec((1, tq, C), lambda b, qi: (b, qi, 0)),        # q tile
            pl.BlockSpec((1, N, C), lambda b, qi: (b, 0, 0)),          # full kv row
            pl.BlockSpec((1, 1, tq, N), lambda b, qi: (b, 0, qi, 0)),  # mask tile
            # TODO(synk): grid-invariant weights are still double-buffered by
            #             default; single-buffer them (or stage via one manual
            #             DMA) for production C under v7x's 64 MiB budget.
            pl.BlockSpec((C, C), lambda b, qi: (0, 0)),                # wq (scaled)
            pl.BlockSpec((C, 2 * C), lambda b, qi: (0, 0)),            # wkv
            pl.BlockSpec((C, C), lambda b, qi: (0, 0)),                # wproj
            pl.BlockSpec((1, C), lambda b, qi: (0, 0)),                # proj bias
        ],
        out_specs=pl.BlockSpec((1, tq, C), lambda b, qi: (b, qi, 0)),
    )

    kernel = functools.partial(_cross_attention_kernel, H, Dh)
    return pl.pallas_call(
        kernel,
        out_shape=jax.ShapeDtypeStruct((B, N, C), q.dtype),
        grid_spec=grid_spec,
        compiler_params=pltpu.CompilerParams(
            dimension_semantics=("parallel", "parallel"),
            vmem_limit_bytes=vmem_limit),
    )(q, kv, mask_bf16, wq, wkv, wp, bp)


# ------------------------------ Reference (JAX) ------------------------------

def cross_attention_reference(q, kv, mask, params, num_heads):
    B, N, C = q.shape
    H = num_heads
    Dh = C // H
    scale = Dh ** (-0.5)

    q_p = q.reshape(B * N, C) @ params["wq"]
    kv_p = kv.reshape(B * N, C) @ params["wkv"]
    q_h = q_p.reshape(B, N, 1, H, Dh).transpose(2, 0, 3, 1, 4)[0]
    kv_h = kv_p.reshape(B, N, 2, H, Dh).transpose(2, 0, 3, 1, 4)
    k_h, v_h = kv_h[0], kv_h[1]

    attn = jnp.einsum("bhnd,bhmd->bhnm", q_h, k_h) * scale
    attn = attn + mask
    attn = jax.nn.softmax(attn, axis=-1)
    x = jnp.einsum("bhnm,bhmd->bhnd", attn, v_h)
    x = x.transpose(0, 2, 1, 3).reshape(B, N, C)
    x = x @ params["wproj"] + params["bproj"]
    return x


# ------------------------------------ Main -----------------------------------

if __name__ == "__main__":
    B, N, C = 2, 8, 32
    NUM_HEADS = 8

    key = jax.random.PRNGKey(0)
    k_q, k_kv, k_m, k_wq, k_wkv, k_wp, k_bp = jax.random.split(key, 7)

    q = jax.random.normal(k_q, (B, N, C), jnp.float32)
    kv = jax.random.normal(k_kv, (B, N, C), jnp.float32)
    # mask broadcast over heads, matching torch `attn += mask`
    mask = jax.random.normal(k_m, (B, 1, N, N), jnp.float32)

    # Deterministic synthetic weights (stored as (Cin, Cout), i.e. W^T of torch)
    params = {
        "wq": 0.05 * jax.random.normal(k_wq, (C, C), jnp.float32),
        "wkv": 0.05 * jax.random.normal(k_wkv, (C, 2 * C), jnp.float32),
        "wproj": 0.05 * jax.random.normal(k_wp, (C, C), jnp.float32),
        "bproj": 0.05 * jax.random.normal(k_bp, (1, C), jnp.float32),
    }

    out = cross_attention_forward(q, kv, mask, params, NUM_HEADS)
    out = jax.block_until_ready(out)

    ref = cross_attention_reference(q, kv, mask, params, NUM_HEADS)
    assert out.shape == (B, N, C)
    # Tolerance accounts for bf16 MXU operands (weights/activations/mask cast
    # to bf16, f32 accumulation); softmax normalization itself is exact f32.
    assert jnp.allclose(out, ref, atol=2e-2, rtol=2e-2), "mismatch vs reference"

    print("KERNEL_OK")
</pallas_src>

<mosaic_0001>
module attributes {stable_mosaic.version = 11 : i64} {
  func.func @_cross_attention_kernel(%arg0: i32, %arg1: i32, %arg2: memref<1x8x32xf32, #tpu.memory_space<vmem>>, %arg3: memref<1x8x32xf32, #tpu.memory_space<vmem>>, %arg4: memref<1x1x8x8xbf16, #tpu.memory_space<vmem>>, %arg5: memref<32x32xbf16, #tpu.memory_space<vmem>>, %arg6: memref<32x64xbf16, #tpu.memory_space<vmem>>, %arg7: memref<32x32xbf16, #tpu.memory_space<vmem>>, %arg8: memref<1x32xf32, #tpu.memory_space<vmem>>, %arg9: memref<1x8x32xf32, #tpu.memory_space<vmem>>) attributes {dimension_semantics = [#tpu.dimension_semantics<parallel>, #tpu.dimension_semantics<parallel>], iteration_bounds = array<i64: 2, 1>, scalar_prefetch = 0 : i64, scratch_operands = 0 : i64, tpu.core_type = #tpu.core_type<tc>, window_params = [{transform_indices = @transform_0, window_bounds = array<i64: 1, 8, 32>}, {transform_indices = @transform_1, window_bounds = array<i64: 1, 8, 32>}, {transform_indices = @transform_2, window_bounds = array<i64: 1, 1, 8, 8>}, {pipeline_mode = #tpu.pipeline_mode<synchronous>, transform_indices = @transform_3, window_bounds = array<i64: 32, 32>}, {pipeline_mode = #tpu.pipeline_mode<synchronous>, transform_indices = @transform_4, window_bounds = array<i64: 32, 64>}, {pipeline_mode = #tpu.pipeline_mode<synchronous>, transform_indices = @transform_5, window_bounds = array<i64: 32, 32>}, {pipeline_mode = #tpu.pipeline_mode<synchronous>, transform_indices = @transform_6, window_bounds = array<i64: 1, 32>}, {transform_indices = @transform_7, window_bounds = array<i64: 1, 8, 32>}]} {
    %c0 = arith.constant 0 : index
    %c0_0 = arith.constant 0 : index
    %c0_1 = arith.constant 0 : index
    %0 = vector.load %arg2[%c0, %c0_0, %c0_1] : memref<1x8x32xf32, #tpu.memory_space<vmem>>, vector<1x8x32xf32>
    %1 = vector.shape_cast %0 : vector<1x8x32xf32> to vector<8x32xf32>
    %2 = arith.truncf %1 : vector<8x32xf32> to vector<8x32xbf16>
    %c0_2 = arith.constant 0 : index
    %c0_3 = arith.constant 0 : index
    %c0_4 = arith.constant 0 : index
    %3 = vector.load %arg3[%c0_2, %c0_3, %c0_4] : memref<1x8x32xf32, #tpu.memory_space<vmem>>, vector<1x8x32xf32>
    %4 = vector.shape_cast %3 : vector<1x8x32xf32> to vector<8x32xf32>
    %5 = arith.truncf %4 : vector<8x32xf32> to vector<8x32xbf16>
    %c0_5 = arith.constant 0 : index
    %c0_6 = arith.constant 0 : index
    %c0_7 = arith.constant 0 : index
    %c0_8 = arith.constant 0 : index
    %6 = vector.load %arg4[%c0_5, %c0_6, %c0_7, %c0_8] : memref<1x1x8x8xbf16, #tpu.memory_space<vmem>>, vector<1x1x8x8xbf16>
    %7 = vector.shape_cast %6 : vector<1x1x8x8xbf16> to vector<8x8xbf16>
    %8 = arith.extf %7 : vector<8x8xbf16> to vector<8x8xf32>
    %c0_9 = arith.constant 0 : index
    %c0_10 = arith.constant 0 : index
    %9 = vector.load %arg5[%c0_9, %c0_10] : memref<32x32xbf16, #tpu.memory_space<vmem>>, vector<32x32xbf16>
    %cst = arith.constant dense<0.000000e+00> : vector<8x32xf32>
    %10 = tpu.matmul %2, %9, %cst {dimension_numbers = #tpu.dot_dimension_numbers<[1], [0], [0], [1], [0, 0, 1, 1], [], []>} : vector<8x32xbf16>, vector<32x32xbf16>, vector<8x32xf32> -> vector<8x32xf32>
    %c0_11 = arith.constant 0 : index
    %c0_12 = arith.constant 0 : index
    %11 = vector.load %arg6[%c0_11, %c0_12] : memref<32x64xbf16, #tpu.memory_space<vmem>>, vector<32x64xbf16>
    %cst_13 = arith.constant dense<0.000000e+00> : vector<8x64xf32>
    %12 = tpu.matmul %5, %11, %cst_13 {dimension_numbers = #tpu.dot_dimension_numbers<[1], [0], [0], [1], [0, 0, 1, 1], [], []>} : vector<8x32xbf16>, vector<32x64xbf16>, vector<8x64xf32> -> vector<8x64xf32>
    %13 = vector.extract_strided_slice %10 {offsets = [0, 0], sizes = [8, 4], strides = [1, 1]} : vector<8x32xf32> to vector<8x4xf32>
    %14 = arith.truncf %13 : vector<8x4xf32> to vector<8x4xbf16>
    %15 = vector.extract_strided_slice %12 {offsets = [0, 0], sizes = [8, 4], strides = [1, 1]} : vector<8x64xf32> to vector<8x4xf32>
    %16 = arith.truncf %15 : vector<8x4xf32> to vector<8x4xbf16>
    %17 = vector.extract_strided_slice %12 {offsets = [0, 32], sizes = [8, 4], strides = [1, 1]} : vector<8x64xf32> to vector<8x4xf32>
    %18 = arith.truncf %17 : vector<8x4xf32> to vector<8x4xbf16>
    %cst_14 = arith.constant dense<0.000000e+00> : vector<8x8xf32>
    %19 = tpu.matmul %14, %16, %cst_14 {dimension_numbers = #tpu.dot_dimension_numbers<[1], [1], [0], [0], [0, 0, 1, 0], [], []>} : vector<8x4xbf16>, vector<8x4xbf16>, vector<8x8xf32> -> vector<8x8xf32>
    %20 = arith.addf %19, %8 : vector<8x8xf32>
    %cst_15 = arith.constant dense<0xFF800000> : vector<8xf32>
    %21 = vector.multi_reduction <maximumf>, %20, %cst_15 [1] : vector<8x8xf32> to vector<8xf32>
    %22 = vector.shape_cast %21 : vector<8xf32> to vector<8x1xf32>
    %23 = vector.broadcast %22 : vector<8x1xf32> to vector<8x8xf32>
    %24 = arith.subf %20, %23 : vector<8x8xf32>
    %25 = math.exp %24 : vector<8x8xf32>
    %cst_16 = arith.constant dense<0.000000e+00> : vector<8xf32>
    %26 = vector.multi_reduction <add>, %25, %cst_16 [1] : vector<8x8xf32> to vector<8xf32>
    %27 = vector.shape_cast %26 : vector<8xf32> to vector<8x1xf32>
    %28 = vector.broadcast %27 : vector<8x1xf32> to vector<8x8xf32>
    %29 = arith.divf %25, %28 : vector<8x8xf32>
    %30 = arith.truncf %29 : vector<8x8xf32> to vector<8x8xbf16>
    %cst_17 = arith.constant dense<0.000000e+00> : vector<8x4xf32>
    %31 = tpu.matmul %30, %18, %cst_17 {dimension_numbers = #tpu.dot_dimension_numbers<[1], [0], [0], [1], [0, 0, 1, 1], [], []>} : vector<8x8xbf16>, vector<8x4xbf16>, vector<8x4xf32> -> vector<8x4xf32>
    %32 = vector.extract_strided_slice %10 {offsets = [0, 4], sizes = [8, 4], strides = [1, 1]} : vector<8x32xf32> to vector<8x4xf32>
    %33 = arith.truncf %32 : vector<8x4xf32> to vector<8x4xbf16>
    %34 = vector.extract_strided_slice %12 {offsets = [0, 4], sizes = [8, 4], strides = [1, 1]} : vector<8x64xf32> to vector<8x4xf32>
    %35 = arith.truncf %34 : vector<8x4xf32> to vector<8x4xbf16>
    %36 = vector.extract_strided_slice %12 {offsets = [0, 36], sizes = [8, 4], strides = [1, 1]} : vector<8x64xf32> to vector<8x4xf32>
    %37 = arith.truncf %36 : vector<8x4xf32> to vector<8x4xbf16>
    %cst_18 = arith.constant dense<0.000000e+00> : vector<8x8xf32>
    %38 = tpu.matmul %33, %35, %cst_18 {dimension_numbers = #tpu.dot_dimension_numbers<[1], [1], [0], [0], [0, 0, 1, 0], [], []>} : vector<8x4xbf16>, vector<8x4xbf16>, vector<8x8xf32> -> vector<8x8xf32>
    %39 = arith.addf %38, %8 : vector<8x8xf32>
    %cst_19 = arith.constant dense<0xFF800000> : vector<8xf32>
    %40 = vector.multi_reduction <maximumf>, %39, %cst_19 [1] : vector<8x8xf32> to vector<8xf32>
    %41 = vector.shape_cast %40 : vector<8xf32> to vector<8x1xf32>
    %42 = vector.broadcast %41 : vector<8x1xf32> to vector<8x8xf32>
    %43 = arith.subf %39, %42 : vector<8x8xf32>
    %44 = math.exp %43 : vector<8x8xf32>
    %cst_20 = arith.constant dense<0.000000e+00> : vector<8xf32>
    %45 = vector.multi_reduction <add>, %44, %cst_20 [1] : vector<8x8xf32> to vector<8xf32>
    %46 = vector.shape_cast %45 : vector<8xf32> to vector<8x1xf32>
    %47 = vector.broadcast %46 : vector<8x1xf32> to vector<8x8xf32>
    %48 = arith.divf %44, %47 : vector<8x8xf32>
    %49 = arith.truncf %48 : vector<8x8xf32> to vector<8x8xbf16>
    %cst_21 = arith.constant dense<0.000000e+00> : vector<8x4xf32>
    %50 = tpu.matmul %49, %37, %cst_21 {dimension_numbers = #tpu.dot_dimension_numbers<[1], [0], [0], [1], [0, 0, 1, 1], [], []>} : vector<8x8xbf16>, vector<8x4xbf16>, vector<8x4xf32> -> vector<8x4xf32>
    %51 = vector.extract_strided_slice %10 {offsets = [0, 8], sizes = [8, 4], strides = [1, 1]} : vector<8x32xf32> to vector<8x4xf32>
    %52 = arith.truncf %51 : vector<8x4xf32> to vector<8x4xbf16>
    %53 = vector.extract_strided_slice %12 {offsets = [0, 8], sizes = [8, 4], strides = [1, 1]} : vector<8x64xf32> to vector<8x4xf32>
    %54 = arith.truncf %53 : vector<8x4xf32> to vector<8x4xbf16>
    %55 = vector.extract_strided_slice %12 {offsets = [0, 40], sizes = [8, 4], strides = [1, 1]} : vector<8x64xf32> to vector<8x4xf32>
    %56 = arith.truncf %55 : vector<8x4xf32> to vector<8x4xbf16>
    %cst_22 = arith.constant dense<0.000000e+00> : vector<8x8xf32>
    %57 = tpu.matmul %52, %54, %cst_22 {dimension_numbers = #tpu.dot_dimension_numbers<[1], [1], [0], [0], [0, 0, 1, 0], [], []>} : vector<8x4xbf16>, vector<8x4xbf16>, vector<8x8xf32> -> vector<8x8xf32>
    %58 = arith.addf %57, %8 : vector<8x8xf32>
    %cst_23 = arith.constant dense<0xFF800000> : vector<8xf32>
    %59 = vector.multi_reduction <maximumf>, %58, %cst_23 [1] : vector<8x8xf32> to vector<8xf32>
    %60 = vector.shape_cast %59 : vector<8xf32> to vector<8x1xf32>
    %61 = vector.broadcast %60 : vector<8x1xf32> to vector<8x8xf32>
    %62 = arith.subf %58, %61 : vector<8x8xf32>
    %63 = math.exp %62 : vector<8x8xf32>
    %cst_24 = arith.constant dense<0.000000e+00> : vector<8xf32>
    %64 = vector.multi_reduction <add>, %63, %cst_24 [1] : vector<8x8xf32> to vector<8xf32>
    %65 = vector.shape_cast %64 : vector<8xf32> to vector<8x1xf32>
    %66 = vector.broadcast %65 : vector<8x1xf32> to vector<8x8xf32>
    %67 = arith.divf %63, %66 : vector<8x8xf32>
    %68 = arith.truncf %67 : vector<8x8xf32> to vector<8x8xbf16>
    %cst_25 = arith.constant dense<0.000000e+00> : vector<8x4xf32>
    %69 = tpu.matmul %68, %56, %cst_25 {dimension_numbers = #tpu.dot_dimension_numbers<[1], [0], [0], [1], [0, 0, 1, 1], [], []>} : vector<8x8xbf16>, vector<8x4xbf16>, vector<8x4xf32> -> vector<8x4xf32>
    %70 = vector.extract_strided_slice %10 {offsets = [0, 12], sizes = [8, 4], strides = [1, 1]} : vector<8x32xf32> to vector<8x4xf32>
    %71 = arith.truncf %70 : vector<8x4xf32> to vector<8x4xbf16>
    %72 = vector.extract_strided_slice %12 {offsets = [0, 12], sizes = [8, 4], strides = [1, 1]} : vector<8x64xf32> to vector<8x4xf32>
    %73 = arith.truncf %72 : vector<8x4xf32> to vector<8x4xbf16>
    %74 = vector.extract_strided_slice %12 {offsets = [0, 44], sizes = [8, 4], strides = [1, 1]} : vector<8x64xf32> to vector<8x4xf32>
    %75 = arith.truncf %74 : vector<8x4xf32> to vector<8x4xbf16>
    %cst_26 = arith.constant dense<0.000000e+00> : vector<8x8xf32>
    %76 = tpu.matmul %71, %73, %cst_26 {dimension_numbers = #tpu.dot_dimension_numbers<[1], [1], [0], [0], [0, 0, 1, 0], [], []>} : vector<8x4xbf16>, vector<8x4xbf16>, vector<8x8xf32> -> vector<8x8xf32>
    %77 = arith.addf %76, %8 : vector<8x8xf32>
    %cst_27 = arith.constant dense<0xFF800000> : vector<8xf32>
    %78 = vector.multi_reduction <maximumf>, %77, %cst_27 [1] : vector<8x8xf32> to vector<8xf32>
    %79 = vector.shape_cast %78 : vector<8xf32> to vector<8x1xf32>
    %80 = vector.broadcast %79 : vector<8x1xf32> to vector<8x8xf32>
    %81 = arith.subf %77, %80 : vector<8x8xf32>
    %82 = math.exp %81 : vector<8x8xf32>
    %cst_28 = arith.constant dense<0.000000e+00> : vector<8xf32>
    %83 = vector.multi_reduction <add>, %82, %cst_28 [1] : vector<8x8xf32> to vector<8xf32>
    %84 = vector.shape_cast %83 : vector<8xf32> to vector<8x1xf32>
    %85 = vector.broadcast %84 : vector<8x1xf32> to vector<8x8xf32>
    %86 = arith.divf %82, %85 : vector<8x8xf32>
    %87 = arith.truncf %86 : vector<8x8xf32> to vector<8x8xbf16>
    %cst_29 = arith.constant dense<0.000000e+00> : vector<8x4xf32>
    %88 = tpu.matmul %87, %75, %cst_29 {dimension_numbers = #tpu.dot_dimension_numbers<[1], [0], [0], [1], [0, 0, 1, 1], [], []>} : vector<8x8xbf16>, vector<8x4xbf16>, vector<8x4xf32> -> vector<8x4xf32>
    %89 = vector.extract_strided_slice %10 {offsets = [0, 16], sizes = [8, 4], strides = [1, 1]} : vector<8x32xf32> to vector<8x4xf32>
    %90 = arith.truncf %89 : vector<8x4xf32> to vector<8x4xbf16>
    %91 = vector.extract_strided_slice %12 {offsets = [0, 16], sizes = [8, 4], strides = [1, 1]} : vector<8x64xf32> to vector<8x4xf32>
    %92 = arith.truncf %91 : vector<8x4xf32> to vector<8x4xbf16>
    %93 = vector.extract_strided_slice %12 {offsets = [0, 48], sizes = [8, 4], strides = [1, 1]} : vector<8x64xf32> to vector<8x4xf32>
    %94 = arith.truncf %93 : vector<8x4xf32> to vector<8x4xbf16>
    %cst_30 = arith.constant dense<0.000000e+00> : vector<8x8xf32>
    %95 = tpu.matmul %90, %92, %cst_30 {dimension_numbers = #tpu.dot_dimension_numbers<[1], [1], [0], [0], [0, 0, 1, 0], [], []>} : vector<8x4xbf16>, vector<8x4xbf16>, vector<8x8xf32> -> vector<8x8xf32>
    %96 = arith.addf %95, %8 : vector<8x8xf32>
    %cst_31 = arith.constant dense<0xFF800000> : vector<8xf32>
    %97 = vector.multi_reduction <maximumf>, %96, %cst_31 [1] : vector<8x8xf32> to vector<8xf32>
    %98 = vector.shape_cast %97 : vector<8xf32> to vector<8x1xf32>
    %99 = vector.broadcast %98 : vector<8x1xf32> to vector<8x8xf32>
    %100 = arith.subf %96, %99 : vector<8x8xf32>
    %101 = math.exp %100 : vector<8x8xf32>
    %cst_32 = arith.constant dense<0.000000e+00> : vector<8xf32>
    %102 = vector.multi_reduction <add>, %101, %cst_32 [1] : vector<8x8xf32> to vector<8xf32>
    %103 = vector.shape_cast %102 : vector<8xf32> to vector<8x1xf32>
    %104 = vector.broadcast %103 : vector<8x1xf32> to vector<8x8xf32>
    %105 = arith.divf %101, %104 : vector<8x8xf32>
    %106 = arith.truncf %105 : vector<8x8xf32> to vector<8x8xbf16>
    %cst_33 = arith.constant dense<0.000000e+00> : vector<8x4xf32>
    %107 = tpu.matmul %106, %94, %cst_33 {dimension_numbers = #tpu.dot_dimension_numbers<[1], [0], [0], [1], [0, 0, 1, 1], [], []>} : vector<8x8xbf16>, vector<8x4xbf16>, vector<8x4xf32> -> vector<8x4xf32>
    %108 = vector.extract_strided_slice %10 {offsets = [0, 20], sizes = [8, 4], strides = [1, 1]} : vector<8x32xf32> to vector<8x4xf32>
    %109 = arith.truncf %108 : vector<8x4xf32> to vector<8x4xbf16>
    %110 = vector.extract_strided_slice %12 {offsets = [0, 20], sizes = [8, 4], strides = [1, 1]} : vector<8x64xf32> to vector<8x4xf32>
    %111 = arith.truncf %110 : vector<8x4xf32> to vector<8x4xbf16>
    %112 = vector.extract_strided_slice %12 {offsets = [0, 52], sizes = [8, 4], strides = [1, 1]} : vector<8x64xf32> to vector<8x4xf32>
    %113 = arith.truncf %112 : vector<8x4xf32> to vector<8x4xbf16>
    %cst_34 = arith.constant dense<0.000000e+00> : vector<8x8xf32>
    %114 = tpu.matmul %109, %111, %cst_34 {dimension_numbers = #tpu.dot_dimension_numbers<[1], [1], [0], [0], [0, 0, 1, 0], [], []>} : vector<8x4xbf16>, vector<8x4xbf16>, vector<8x8xf32> -> vector<8x8xf32>
    %115 = arith.addf %114, %8 : vector<8x8xf32>
    %cst_35 = arith.constant dense<0xFF800000> : vector<8xf32>
    %116 = vector.multi_reduction <maximumf>, %115, %cst_35 [1] : vector<8x8xf32> to vector<8xf32>
    %117 = vector.shape_cast %116 : vector<8xf32> to vector<8x1xf32>
    %118 = vector.broadcast %117 : vector<8x1xf32> to vector<8x8xf32>
    %119 = arith.subf %115, %118 : vector<8x8xf32>
    %120 = math.exp %119 : vector<8x8xf32>
    %cst_36 = arith.constant dense<0.000000e+00> : vector<8xf32>
    %121 = vector.multi_reduction <add>, %120, %cst_36 [1] : vector<8x8xf32> to vector<8xf32>
    %122 = vector.shape_cast %121 : vector<8xf32> to vector<8x1xf32>
    %123 = vector.broadcast %122 : vector<8x1xf32> to vector<8x8xf32>
    %124 = arith.divf %120, %123 : vector<8x8xf32>
    %125 = arith.truncf %124 : vector<8x8xf32> to vector<8x8xbf16>
    %cst_37 = arith.constant dense<0.000000e+00> : vector<8x4xf32>
    %126 = tpu.matmul %125, %113, %cst_37 {dimension_numbers = #tpu.dot_dimension_numbers<[1], [0], [0], [1], [0, 0, 1, 1], [], []>} : vector<8x8xbf16>, vector<8x4xbf16>, vector<8x4xf32> -> vector<8x4xf32>
    %127 = vector.extract_strided_slice %10 {offsets = [0, 24], sizes = [8, 4], strides = [1, 1]} : vector<8x32xf32> to vector<8x4xf32>
    %128 = arith.truncf %127 : vector<8x4xf32> to vector<8x4xbf16>
    %129 = vector.extract_strided_slice %12 {offsets = [0, 24], sizes = [8, 4], strides = [1, 1]} : vector<8x64xf32> to vector<8x4xf32>
    %130 = arith.truncf %129 : vector<8x4xf32> to vector<8x4xbf16>
    %131 = vector.extract_strided_slice %12 {offsets = [0, 56], sizes = [8, 4], strides = [1, 1]} : vector<8x64xf32> to vector<8x4xf32>
    %132 = arith.truncf %131 : vector<8x4xf32> to vector<8x4xbf16>
    %cst_38 = arith.constant dense<0.000000e+00> : vector<8x8xf32>
    %133 = tpu.matmul %128, %130, %cst_38 {dimension_numbers = #tpu.dot_dimension_numbers<[1], [1], [0], [0], [0, 0, 1, 0], [], []>} : vector<8x4xbf16>, vector<8x4xbf16>, vector<8x8xf32> -> vector<8x8xf32>
    %134 = arith.addf %133, %8 : vector<8x8xf32>
    %cst_39 = arith.constant dense<0xFF800000> : vector<8xf32>
    %135 = vector.multi_reduction <maximumf>, %134, %cst_39 [1] : vector<8x8xf32> to vector<8xf32>
    %136 = vector.shape_cast %135 : vector<8xf32> to vector<8x1xf32>
    %137 = vector.broadcast %136 : vector<8x1xf32> to vector<8x8xf32>
    %138 = arith.subf %134, %137 : vector<8x8xf32>
    %139 = math.exp %138 : vector<8x8xf32>
    %cst_40 = arith.constant dense<0.000000e+00> : vector<8xf32>
    %140 = vector.multi_reduction <add>, %139, %cst_40 [1] : vector<8x8xf32> to vector<8xf32>
    %141 = vector.shape_cast %140 : vector<8xf32> to vector<8x1xf32>
    %142 = vector.broadcast %141 : vector<8x1xf32> to vector<8x8xf32>
    %143 = arith.divf %139, %142 : vector<8x8xf32>
    %144 = arith.truncf %143 : vector<8x8xf32> to vector<8x8xbf16>
    %cst_41 = arith.constant dense<0.000000e+00> : vector<8x4xf32>
    %145 = tpu.matmul %144, %132, %cst_41 {dimension_numbers = #tpu.dot_dimension_numbers<[1], [0], [0], [1], [0, 0, 1, 1], [], []>} : vector<8x8xbf16>, vector<8x4xbf16>, vector<8x4xf32> -> vector<8x4xf32>
    %146 = vector.extract_strided_slice %10 {offsets = [0, 28], sizes = [8, 4], strides = [1, 1]} : vector<8x32xf32> to vector<8x4xf32>
    %147 = arith.truncf %146 : vector<8x4xf32> to vector<8x4xbf16>
    %148 = vector.extract_strided_slice %12 {offsets = [0, 28], sizes = [8, 4], strides = [1, 1]} : vector<8x64xf32> to vector<8x4xf32>
    %149 = arith.truncf %148 : vector<8x4xf32> to vector<8x4xbf16>
    %150 = vector.extract_strided_slice %12 {offsets = [0, 60], sizes = [8, 4], strides = [1, 1]} : vector<8x64xf32> to vector<8x4xf32>
    %151 = arith.truncf %150 : vector<8x4xf32> to vector<8x4xbf16>
    %cst_42 = arith.constant dense<0.000000e+00> : vector<8x8xf32>
    %152 = tpu.matmul %147, %149, %cst_42 {dimension_numbers = #tpu.dot_dimension_numbers<[1], [1], [0], [0], [0, 0, 1, 0], [], []>} : vector<8x4xbf16>, vector<8x4xbf16>, vector<8x8xf32> -> vector<8x8xf32>
    %153 = arith.addf %152, %8 : vector<8x8xf32>
    %cst_43 = arith.constant dense<0xFF800000> : vector<8xf32>
    %154 = vector.multi_reduction <maximumf>, %153, %cst_43 [1] : vector<8x8xf32> to vector<8xf32>
    %155 = vector.shape_cast %154 : vector<8xf32> to vector<8x1xf32>
    %156 = vector.broadcast %155 : vector<8x1xf32> to vector<8x8xf32>
    %157 = arith.subf %153, %156 : vector<8x8xf32>
    %158 = math.exp %157 : vector<8x8xf32>
    %cst_44 = arith.constant dense<0.000000e+00> : vector<8xf32>
    %159 = vector.multi_reduction <add>, %158, %cst_44 [1] : vector<8x8xf32> to vector<8xf32>
    %160 = vector.shape_cast %159 : vector<8xf32> to vector<8x1xf32>
    %161 = vector.broadcast %160 : vector<8x1xf32> to vector<8x8xf32>
    %162 = arith.divf %158, %161 : vector<8x8xf32>
    %163 = arith.truncf %162 : vector<8x8xf32> to vector<8x8xbf16>
    %cst_45 = arith.constant dense<0.000000e+00> : vector<8x4xf32>
    %164 = tpu.matmul %163, %151, %cst_45 {dimension_numbers = #tpu.dot_dimension_numbers<[1], [0], [0], [1], [0, 0, 1, 1], [], []>} : vector<8x8xbf16>, vector<8x4xbf16>, vector<8x4xf32> -> vector<8x4xf32>
    %165 = tpu.concatenate %31, %50, %69, %88, %107, %126, %145, %164 in 1 : vector<8x4xf32>, vector<8x4xf32>, vector<8x4xf32>, vector<8x4xf32>, vector<8x4xf32>, vector<8x4xf32>, vector<8x4xf32>, vector<8x4xf32> -> vector<8x32xf32>
    %166 = arith.truncf %165 : vector<8x32xf32> to vector<8x32xbf16>
    %c0_46 = arith.constant 0 : index
    %c0_47 = arith.constant 0 : index
    %167 = vector.load %arg7[%c0_46, %c0_47] : memref<32x32xbf16, #tpu.memory_space<vmem>>, vector<32x32xbf16>
    %cst_48 = arith.constant dense<0.000000e+00> : vector<8x32xf32>
    %168 = tpu.matmul %166, %167, %cst_48 {dimension_numbers = #tpu.dot_dimension_numbers<[1], [0], [0], [1], [0, 0, 1, 1], [], []>} : vector<8x32xbf16>, vector<32x32xbf16>, vector<8x32xf32> -> vector<8x32xf32>
    %c0_49 = arith.constant 0 : index
    %c0_50 = arith.constant 0 : index
    %169 = vector.load %arg8[%c0_49, %c0_50] : memref<1x32xf32, #tpu.memory_space<vmem>>, vector<1x32xf32>
    %170 = vector.broadcast %169 : vector<1x32xf32> to vector<8x32xf32>
    %171 = arith.addf %168, %170 : vector<8x32xf32>
    %c0_51 = arith.constant 0 : index
    %c0_52 = arith.constant 0 : index
    %c0_53 = arith.constant 0 : index
    %172 = vector.load %arg9[%c0_51, %c0_52, %c0_53] : memref<1x8x32xf32, #tpu.memory_space<vmem>>, vector<1x8x32xf32>
    %173 = vector.shape_cast %172 : vector<1x8x32xf32> to vector<8x32xf32>
    %174 = vector.shape_cast %171 : vector<8x32xf32> to vector<1x8x32xf32>
    tpu.vector_store %arg9[%c0_51, %c0_52, %c0_53], %174 {strides = array<i32>} : memref<1x8x32xf32, #tpu.memory_space<vmem>>, vector<1x8x32xf32>,
    return
  }
  func.func @transform_0(%arg0: i32, %arg1: i32) -> (i32, i32, i32) {
    %c0_i32 = arith.constant 0 : i32
    %c0_i32_0 = arith.constant 0 : i32
    return %arg0, %arg1, %c0_i32 : i32, i32, i32
  }
  func.func @transform_1(%arg0: i32, %arg1: i32) -> (i32, i32, i32) {
    %c0_i32 = arith.constant 0 : i32
    %c0_i32_0 = arith.constant 0 : i32
    %c0_i32_1 = arith.constant 0 : i32
    return %arg0, %c0_i32, %c0_i32_0 : i32, i32, i32
  }
  func.func @transform_2(%arg0: i32, %arg1: i32) -> (i32, i32, i32, i32) {
    %c0_i32 = arith.constant 0 : i32
    %c0_i32_0 = arith.constant 0 : i32
    %c0_i32_1 = arith.constant 0 : i32
    return %arg0, %c0_i32, %arg1, %c0_i32_0 : i32, i32, i32, i32
  }
  func.func @transform_3(%arg0: i32, %arg1: i32) -> (i32, i32) {
    %c0_i32 = arith.constant 0 : i32
    %c0_i32_0 = arith.constant 0 : i32
    %c0_i32_1 = arith.constant 0 : i32
    return %c0_i32, %c0_i32_0 : i32, i32
  }
  func.func @transform_4(%arg0: i32, %arg1: i32) -> (i32, i32) {
    %c0_i32 = arith.constant 0 : i32
    %c0_i32_0 = arith.constant 0 : i32
    %c0_i32_1 = arith.constant 0 : i32
    return %c0_i32, %c0_i32_0 : i32, i32
  }
  func.func @transform_5(%arg0: i32, %arg1: i32) -> (i32, i32) {
    %c0_i32 = arith.constant 0 : i32
    %c0_i32_0 = arith.constant 0 : i32
    %c0_i32_1 = arith.constant 0 : i32
    return %c0_i32, %c0_i32_0 : i32, i32
  }
  func.func @transform_6(%arg0: i32, %arg1: i32) -> (i32, i32) {
    %c0_i32 = arith.constant 0 : i32
    %c0_i32_0 = arith.constant 0 : i32
    %c0_i32_1 = arith.constant 0 : i32
    return %c0_i32, %c0_i32_0 : i32, i32
  }
  func.func @transform_7(%arg0: i32, %arg1: i32) -> (i32, i32, i32) {
    %c0_i32 = arith.constant 0 : i32
    %c0_i32_0 = arith.constant 0 : i32
    return %arg0, %arg1, %c0_i32 : i32, i32, i32
  }
}

</mosaic_0001>

<bundles_post_ra>
// kernel: tpu_custom_call.1
= control target key start
LH: loop header
LB: loop body
LE: loop exit
PB: predicated region body
PF: predicated region fallthrough
CT: control target
= control target key end

     0   :  { %s2253_s0 = inlined_call_operand.hbm [shape: f32[2,8,32], index: 0, kind: input, shape index: {}]   ;;  %s2254_s1 = inlined_call_operand.hbm [shape: f32[2,8,32], index: 1, kind: input, shape index: {}]   ;;  %s2255_s2 = inlined_call_operand.hbm [shape: bf16[2,1,8,8], index: 2, kind: input, shape index: {}]   ;;  %s2256_s3 = inlined_call_operand.hbm [shape: bf16[32,32], index: 3, kind: input, shape index: {}]   ;;  %s2257_s4 = inlined_call_operand.hbm [shape: bf16[32,64], index: 4, kind: input, shape index: {}]   ;;  %s2258_s5 = inlined_call_operand.hbm [shape: bf16[32,32], index: 5, kind: input, shape index: {}]   ;;  %s2259_s6 = inlined_call_operand.vmem [shape: f32[1,32], index: 6, kind: input, shape index: {}]   ;;  %s2260_s7 = inlined_call_operand.hbm [shape: f32[2,8,32], index: 7, kind: output, shape index: {}]  }
   0x1   :  { %2271 = sst [smem:[#allocation25_spill]] %s2254_s1 }
   0x2   :  { %2272 = sst [smem:[#allocation26_spill]] %s2256_s3 }
   0x3   :  { %2273 = sst [smem:[#allocation27_spill]] %s2257_s4 }
   0x4   :  { %2274 = sst [smem:[#allocation28_spill]] %s2258_s5 }
   0x5   :  { %12 = vsyncpa [#allocation3], 0 }
   0x6   :  { %14 = vsyncpa [#allocation3 + $0x1], 0 }
   0x7   :  { %15 = vsyncpa [#allocation6], 0 }
   0x8   :  { %17 = vsyncpa [#allocation6 + $0x1], 0 }
   0x9   :  { %18 = vsyncpa [#allocation9], 0 }
   0xa   :  { %19 = vsyncpa [#allocation12], 0 }
   0xb   :  { %20 = vsyncpa [#allocation4], 0 }
   0xc   :  { %22 = vsyncpa [#allocation4 + $0x1], 0  ;;  %s1893_s24 = smov 0   ;;  %s1895_s25 = smov 0  }
   0xd   :  { %s1897_s26 = smov 0   ;;  %s1899_s27 = smov 0  }
   0xe   :  { %s1901_s28 = smov 0   ;;  %s1903_s29 = smov 0  }
   0xf LB: > { %2275 = sst [smem:[#allocation19_spill]] %s1804_s24  ;;  %s1924_s30 = sadd.s32 4294967295, %s1824_s29   ;;  %s1824_s29 = sphi %s1903_s29, %s28_s29   ;;  %s1820_s28 = sphi %s1901_s28, %s2304_s28   ;;  %s1816_s27 = sphi %s1899_s27, %s2303_s27   ;;  %s1812_s26 = sphi %s1897_s26, %s2299_s26   ;;  %s1808_s25 = sphi %s1895_s25, %s2302_s25   ;;  %s1804_s24 = sphi %s1893_s24, %s2301_s24  }
  0x10   : > { %2276 = sst [smem:[#allocation20_spill]] %s1812_s26  ;;  %p1318_p0 = scmp.ge.s32.totalorder %s1824_s29, 1 }
  0x11   : > { %2277 = sst [smem:[#allocation21_spill]] %s1824_s29  ;;  %p63_p1 = scmp.eq.s32.totalorder %s1924_s30, 0 }
  0x12   : > { %p239_p2 = scmp.lt.s32.totalorder %s1824_s29, 3  ;;  %s2278_s3 = sld [smem:[#allocation26_spill]] }
  0x13   : > { %s1826_s12 = smov [#allocation8]   ;;  %s2261_s15 = smov 64  }
  0x14   : > { %p1932_p3 = pnand %p1318_p0, %p239_p2  ;;  %s252_s13 = sshll.u32 %s1826_s12, 4  ;;  %s253_s13 = int_to_ptr.vmem [resolvable:$true] %s252_s13 }
  0x15   : > { %s2263_s16 = smov 4   ;;  %s1317_s17 = sadd.s32 4294967294, %s1824_s29  }
  0x16   : > { %p1410_p4 = pneg %p1932_p3  ;;  %s40_s18 = sadd.s32 1, %s1820_s28 }
  0x17   : > { %s49_s19 = sadd.s32 1, %s1812_s26  ;;  %p42_p7 = scmp.ge.s32.totalorder %s40_s18, 2 }
  0x18   : > { %s250_s10 = sshll.u32 %s2278_s3, 4  ;;  %p1940_p5 = pnand %p1410_p4, %p63_p1  ;;  %s251_s10 = int_to_ptr.hbm [resolvable:$true] %s250_s10 }
  0x19   : > { %p56_p8 = scmp.ne.s32.totalorder %s1812_s26, %s1808_s25  ;;  %p57_p9 = scmp.eq.s32.totalorder %s1824_s29, 0 }
  0x1a   : > { %1413 = dma.hbm_to_vmem [thread:$0]  (!%p1940_p5), %s251_s10, 256, %s253_s13, [#allocation9], %s2261_s15, %s2261_s15, %s2263_s16  }
  0x1b   : > { %p62_p10 = scmp.ne.s32.totalorder %s1808_s25, %s1804_s24  ;;  %s2306_s18 = smov (%p42_p7, %s40_s18), 0 }
  0x1c   : > { %2281 = sst [smem:[#allocation22_spill]] %s2306_s18  ;;  %p1960_p11 = por %p57_p9, %p56_p8 }
  0x1d   : > { %p1966_p12 = por %p63_p1, %p62_p10  ;;  %s44_s22 = ssub.s32 %s1820_s28, %s2306_s18 }
  0x1e   : > { %p226_p13 = scmp.eq.s32.totalorder %s1924_s30, 1  ;;  %p47_p0 = scmp.eq.s32.totalorder %s44_s22, 0 }
  0x1f   : > { %p232_p2 = scmp.eq.s32.totalorder %s1317_s17, 1  ;;  %p1437_p7 = scmp.lt.s32.totalorder %s1824_s29, 2 }
  0x20   : > { %p1973_p4 = por %p226_p13, %p56_p8  ;;  %s1986_s10 = sand.u32 1, %s1812_s26  }
  0x21   : > { %s1979_s8 = scalar_select %p47_p0, %s1812_s26, %s49_s19  }
  0x22   : > { %p1981_p9 = por %p232_p2, %p62_p10  ;;  %s1323_s12 = sshll.u32 %s1986_s10, 3 }
  0x23   : > { %2285 = sst [smem:[#allocation23_spill]] %s1979_s8  ;;  %s1324_s13 = sshll.u32 %s1820_s28, 3 }
  0x24   : > { %s2286_s9 = scalar_select %p1981_p9, 1, 0 }
  0x25   : > { %p1992_p6 = pnand %p1437_p7, %p1960_p11  ;;  %s317_s17 = sand.u32 1, %s1824_s29  }
  0x26   : > { %2287 = sst [smem:[#allocation24_spill]] %s2286_s9  ;;  %s321_s18 = scalar_lea.vmem [#allocation5], %s1323_s12 }
  0x27   : > { %s2289_s1 = sld [smem:[#allocation25_spill]]  ;;  %s329_s8 = sshll.u32 %s321_s18, 4  ;;  %s330_s8 = int_to_ptr.vmem [resolvable:$true] %s329_s8 }
  0x28   : > { %s2000_s26 = scalar_lea.sflag [#allocation6], %s317_s17  ;;  %s2290_s4 = sld [smem:[#allocation27_spill]] }
  0x29   : > { %s1829_s29 = smov [#allocation10]   ;;  %s2291_s5 = sld [smem:[#allocation28_spill]] }
  0x2a   : > { %s266_s15 = sshll.u32 %s1829_s29, 4  ;;  %s2292_s17 = smov 4   ;;  %s267_s15 = int_to_ptr.vmem [resolvable:$true] %s266_s15 }
  0x2b   : > { %s306_s20 = scalar_lea.hbm %s2253_s0, %s1324_s13  ;;  %s1328_s14 = sshll.u32 %s1820_s28, 2 }
  0x2d   : > { %s325_s16 = scalar_lea.hbm %s2289_s1, %s1324_s13  ;;  %s2293_s1 = smov 64  }
  0x2e   : > { %s327_s3 = sshll.u32 %s325_s16, 4  ;;  %s264_s24 = sshll.u32 %s2290_s4, 4  ;;  %s328_s3 = int_to_ptr.hbm [resolvable:$true] %s327_s3  ;;  %s265_s24 = int_to_ptr.hbm [resolvable:$true] %s264_s24 }
  0x2f   : > { %1426 = dma.hbm_to_vmem [thread:$0]  (!%p1992_p6), %s328_s3, 128, %s330_s8, %s2000_s26  }
  0x30   : > { %s278_s19 = sshll.u32 %s2291_s5, 4  ;;  %s1830_s3 = smov [#allocation11]   ;;  %s279_s19 = int_to_ptr.hbm [resolvable:$true] %s278_s19 }
  0x31   : > { %1416 = dma.hbm_to_vmem [thread:$0]  (!%p1940_p5), %s265_s24, 256, %s267_s15, [#allocation9], %s2293_s1, %s2293_s1, %s2292_s17  }
  0x32   : > { %s280_s8 = sshll.u32 %s1830_s3, 4  ;;  %s301_s16 = scalar_lea.vmem [#allocation2], %s1323_s12  ;;  %s281_s8 = int_to_ptr.vmem [resolvable:$true] %s280_s8 }
  0x33   : > { %1419 = dma.hbm_to_vmem [thread:$0]  (!%p1940_p5), %s279_s19, 256, %s281_s8, [#allocation12], %s2293_s1, %s2293_s1, %s2292_s17  }
  0x34   : > { %s310_s18 = sshll.u32 %s301_s16, 4  ;;  %s308_s4 = sshll.u32 %s306_s20, 4  ;;  %s311_s18 = int_to_ptr.vmem [resolvable:$true] %s310_s18  ;;  %s309_s4 = int_to_ptr.hbm [resolvable:$true] %s308_s4 }
  0x35   : > { %s1327_s24 = sshll.u32 %s1986_s10, 2  ;;  %s298_s15 = scalar_lea.sflag [#allocation3], %s1986_s10 }
  0x36   : > { %1423 = dma.hbm_to_vmem [thread:$0]  (!%p1992_p6), %s309_s4, 128, %s311_s18, %s298_s15  }
  0x37   : > { %s345_s1 = scalar_lea.hbm %s2255_s2, %s1328_s14  ;;  %s340_s19 = scalar_lea.vmem [#allocation7], %s1327_s24 }
  0x38   : > { %s349_s17 = sshll.u32 %s340_s19, 4  ;;  %s347_s8 = sshll.u32 %s345_s1, 4  ;;  %s350_s17 = int_to_ptr.vmem [resolvable:$true] %s349_s17  ;;  %s348_s8 = int_to_ptr.hbm [resolvable:$true] %s347_s8 }
  0x39   : > { %1429 = dma.hbm_to_vmem [thread:$0]  (!%p1992_p6), %s348_s8, 64, %s350_s17, %s2000_s26  }
  0x3a   : > { %358 = sbr.rel (%p1932_p3) target bundleno = 1492 (0x5d4), region = 48  ;;  %s2038_s10 = sand.u32 (!%p1932_p3), 1, %s1808_s25  }
  0x3b   : > { %s2041_s4 = sshll.u32 (!%p1932_p3), %s2038_s10, 3  ;;  %s361_s5 = scalar_lea.sflag (!%p1932_p3), [#allocation3], %s2038_s10 }
  0x3c   : > { %s364_s12 = scalar_lea.vmem (!%p1932_p3), [#allocation2], %s2041_s4 }
  0x3f   : > { %1783 = dma.done.wait (%p1966_p12), %s361_s5, 128  }
  0x40   : > { %1785 = vsyncadd (%p1966_p12), %s361_s5, 4294967168  ;;  %s370_s26 = sand.u32 1, %s1924_s30   ;;  %s374_s13 = scalar_lea.vmem [#allocation5], %s2041_s4 }
  0x41   : > { %s371_s11 = scalar_lea.sflag [#allocation6], %s370_s26 }
  0x42   : > { %1787 = dma.done.wait (%p1966_p12), %s371_s11, 192  }
  0x43   : > { %1789 = vsyncadd (%p1966_p12), %s371_s11, 4294967104  ;;  %s1332_s22 = sshll.u32 %s2038_s10, 2 }
  0x44   : > { %s2056_s29 = scalar_lea.vmem [#allocation7], %s1332_s22 }
  0x45   : > { %1791 = dma.done.wait (%p63_p1), [#allocation9], 512  }
  0x46   : > { %1793 = vsyncadd (%p63_p1), [#allocation9], 4294966784 }
  0x47   : > { %1795 = dma.done.wait (%p63_p1), [#allocation12], 256  }
  0x48   : > { %1797 = vsyncadd (%p63_p1), [#allocation12], 4294967040  ;;  %v1385_v0 = vld [vmem:[#allocation8 + $0x8] sm:$0xff]  ;;  %v1387_v1 = vld [vmem:[#allocation10 + $0x8] sm:$0xff]  ;;  %vm464_vm0 = vcmask 261120   ;;  %vm515_vm1 = vcmask 31744  }
  0x49   : > { %v1384_v2 = vld [vmem:[#allocation8] sm:$0xff]  ;;  %v1386_v3 = vld [vmem:[#allocation10] sm:$0xff]  ;;  %474 = vmatpush.bf16.msra.mxu0 %v1385_v0  ;;  %506 = vmatpush.bf16.msra.mxu1 %v1387_v1  ;;  %s1831_s30 = smov 96   ;;  %s1832_s21 = smov 124   ;;  %vm567_vm2 = vcmask 1043456   ;;  %vm535_vm3 = vcmask 64512  }
  0x4a   : > { %v442_v4 = vld [vmem:[%s364_s12] sm:$0xff]  ;;  %v444_v5 = vld [vmem:[%s374_s13] sm:$0xff]  ;;  %s1833_s9 = smov 120   ;;  %s1834_s20 = smov 116  }
  0x4b   : > { %v443_v6 = vpack.c.bf16 %v442_v4, %v442_v4  ;;  %v445_v7 = vpack.c.bf16 %v444_v5, %v444_v5  ;;  %s1835_s16 = smov 112   ;;  %s1836_s18 = smov 108   ;;  %v446_v23 = vld [vmem:[%s2056_s29] sm:$0xf] }
  0x4c   : > { %s1837_s24 = smov 100   ;;  %s1838_s15 = smov 104   ;;  %v2098_v24 = vunpack.c.l.bf16 %v446_v23 }
  0x4d   : > { %475 = vmatpush.bf16.msra.mxu0 %v1384_v2  ;;  %507 = vmatpush.bf16.msra.mxu1 %v1386_v3  ;;  %s1839_s14 = smov 84   ;;  %s1840_s3 = smov 88  }
  0x4e   : > { %s1841_s1 = smov 92   ;;  %s1842_s19 = smov 80  }
  0x4f   : > { %s1843_s17 = smov 76   ;;  %s1844_s8 = smov 72  }
  0x50   : > { %1345 = vmatmul.msk.bf16.vlgmr.msra.gmra.mxu0 %vm464_vm0, %v443_v6  ;;  %1354 = vmatmul.msk.bf16.vlgmr.msra.gmra.mxu1 %vm464_vm0, %v445_v7  ;;  %s1845_s5 = smov 68   ;;  %s1846_s12 = smov 8  }
  0x51   : > { %s1847_s26 = smov 16   ;;  %s1848_s11 = smov 4  }
  0x52   : > { %s1849_s13 = smov 12   ;;  %s1850_s22 = smov 20  }
  0x53   : > { %s1851_s29 = smov 24  }
  0xcd   : > { %v477_v8 = vpop.f32.mrf.mxu0  ;;  %v509_v9 = vpop.f32.mrf.mxu1 }
  0xce   : > { %v2068_v10 = vpack.c.bf16 %v477_v8, %v477_v8  ;;  %v2070_v11 = vpack.c.bf16 %v509_v9, %v509_v9 }
  0xd0   : > { %562 = vrot.lane.b32.xlu1 %v2070_v11, %s1831_s30  ;;  %585 = vrot.lane.b32.xlu2 %v2068_v10, %s1832_s21  ;;  %v520_v12 = vsel %vm515_vm1, %v2070_v11, 0  ;;  %s1852_s30 = smov 28  }
  0xd1   : > { %529 = vmatpush.bf16.xpose.msra.mxu2 %v520_v12 }
  0xd5   : > { %v479_v13 = vpop.f32.mrf.mxu0  ;;  %v511_v14 = vpop.f32.mrf.mxu1 }
  0xd8   : > { %587 = vrot.lane.b32.xlu1 %v2070_v11, %s1832_s21  ;;  %656 = vrot.lane.b32.xlu2 %v2070_v11, %s1833_s9  ;;  %s1381_s21 = sshll.u32 %s1816_s27, 3 }
  0xd9   : > { %1355 = vmatmul.msk.bf16.vlgmr.msra.gmra.mxu2 %vm515_vm1, %v2068_v10 }
  0xe0   : > { %654 = vrot.lane.b32.xlu1 %v2068_v10, %s1833_s9  ;;  %723 = vrot.lane.b32.xlu2 %v2068_v10, %s1834_s20 }
  0xe8   : > { %794 = vrot.lane.b32.xlu1 %v2070_v11, %s1835_s16  ;;  %863 = vrot.lane.b32.xlu2 %v2070_v11, %s1836_s18 }
  0xf0   : > { %792 = vrot.lane.b32.xlu1 %v2068_v10, %s1835_s16  ;;  %861 = vrot.lane.b32.xlu2 %v2068_v10, %s1836_s18  ;;  %s1158_s16 = scalar_lea.hbm %s2260_s7, %s1381_s21 }
  0xf8   : > { %1001 = vrot.lane.b32.xlu1 %v2070_v11, %s1837_s24  ;;  %930 = vrot.lane.b32.xlu2 %v2068_v10, %s1838_s15 }
 0x12a   : > { %v2091_v15 = vpop.permute.xlu2 %585 }
 0x132   : > { %v657_v16 = vpop.permute.xlu2 %656 }
 0x133   : > { %v662_v17 = vsel %vm515_vm1, %v657_v16, 0 }
 0x134   : > { %671 = vmatpush.bf16.xpose.msrb.mxu1 %v662_v17 }
 0x13a   : > { %v724_v46 = vpop.permute.xlu2 %723 }
 0x142   : > { %v563_v18 = vpop.permute.xlu1 %562  ;;  %v864_v54 = vpop.permute.xlu2 %863 }
 0x143   : > { %v569_v19 = vsel %vm567_vm2, %v563_v18, 0  ;;  %v869_v2 = vsel %vm515_vm1, %v864_v54, 0 }
 0x144   : > { %578 = vmatpush.bf16.msra.mxu3 %v569_v19 }
 0x14a   : > { %v588_v20 = vpop.permute.xlu1 %587  ;;  %v862_v62 = vpop.permute.xlu2 %861 }
 0x14b   : > { %v593_v21 = vsel %vm515_vm1, %v588_v20, 0 }
 0x14c   : > { %602 = vmatpush.bf16.xpose.msrb.mxu3 %v593_v21 }
 0x152   : > { %v655_v22 = vpop.permute.xlu1 %654  ;;  %v931_v1 = vpop.permute.xlu2 %930 }
 0x153   : > { %1359 = vmatmul.msk.bf16.vlgmr.msrb.gmra.mxu1 %vm515_vm1, %v655_v22 }
 0x15a   : > { %v795_v25 = vpop.permute.xlu1 %794 }
 0x15b   : > { %v800_v26 = vsel %vm515_vm1, %v795_v25, 0 }
 0x15c   : > { %v531_v27 = vpop.f32.mrf.mxu2  ;;  %809 = vmatpush.bf16.xpose.msra.mxu1 %v800_v26 }
 0x15d   : > { %v532_v28 = vadd.f32 %v531_v27, %v2098_v24 }
 0x15f   : > { %v536_v29 = vsel %vm535_vm3, %v532_v28, -inf }
 0x160   : > { %537 = vmax.xlane.f32.xlu0 %v536_v29 }
 0x162   : > { %v793_v30 = vpop.permute.xlu1 %792 }
 0x163   : > { %1363 = vmatmul.msk.bf16.vlgmr.msra.gmra.mxu1 %vm515_vm1, %v793_v30 }
 0x164   : > { %v533_v31 = vpop.f32.mrf.mxu2 }
 0x16a   : > { %v1002_v3 = vpop.permute.xlu1 %1001 }
 0x16b   : > { %v1007_v4 = vsel %vm515_vm1, %v1002_v3, 0 }
 0x1d0   : > { %v673_v32 = vpop.f32.mrf.mxu1 }
 0x1d1   : > { %v674_v33 = vadd.f32 %v673_v32, %v2098_v24 }
 0x1d3   : > { %v538_v34 = vpop.xlane.xlu0 %537  ;;  %v677_v35 = vsel %vm535_vm3, %v674_v33, -inf }
 0x1d4   : > { %v539_v36 = vsub.f32 %v532_v28, %v538_v34  ;;  %678 = vmax.xlane.f32.xlu2 %v677_v35 }
 0x1d6   : > { %v540_v37 = vmul.f32 1.442695, %v539_v36 }
 0x1d8   : > { %1518 = vpow2.f32 %v540_v37  ;;  %v675_v38 = vpop.f32.mrf.mxu1 }
 0x1de   : > { %v1519_v39 = vpop.eup %1518 }
 0x1df   : > { %v542_v40 = vsel %vm535_vm3, %v1519_v39, 0.0 }
 0x1e0   : > { %543 = vadd.xlane.f32.xlu0 %v542_v40  ;;  %v811_v41 = vpop.f32.mrf.mxu1 }
 0x1e1   : > { %v2108_v42 = vadd.f32 %v811_v41, %v2098_v24 }
 0x1e3   : > { %v815_v43 = vsel %vm535_vm3, %v2108_v42, -inf }
 0x1e4   : > { %816 = vmax.xlane.f32.xlu2 %v815_v43 }
 0x1e8   : > { %v813_v44 = vpop.f32.mrf.mxu1 }
 0x1f4   : > { %725 = vrot.lane.b32.xlu0 %v2070_v11, %s1834_s20 }
 0x1fc   : > { %932 = vrot.lane.b32.xlu0 %v2070_v11, %s1838_s15  ;;  %s440_s15 = scalar_lea.vmem [#allocation13], %s2041_s4  ;;  %s1750_s4 = scalar_lea.hbm %s2260_s7, 16 }
 0x204   : > { %999 = vrot.lane.b32.xlu0 %v2068_v10, %s1837_s24 }
 0x247   : > { %v679_v6 = vpop.xlane.xlu2 %678 }
 0x248   : > { %v680_v8 = vsub.f32 %v674_v33, %v679_v6 }
 0x24a   : > { %v681_v9 = vmul.f32 1.442695, %v680_v8 }
 0x253   : > { %v544_v45 = vpop.xlane.xlu0 %543 }
 0x254   : > { %1520 = vrcp.f32 %v544_v45  ;;  %v556_v50 = vand.u32 2147483648, %v544_v45  ;;  %v554_v52 = vand.u32 2147483647, %v544_v45  ;;  %vm550_vm5 = vweird.f32 %v544_v45 }
 0x255   : > { %1522 = vpow2.f32 %v681_v9 }
 0x256   : > { %v557_v55 = vor.u32 1.1754944e-38, %v556_v50  ;;  %vm555_vm7 = vcmp.eq.f32.partialorder %v554_v52, 8.507059e+37 }
 0x257   : > { %v817_v21 = vpop.xlane.xlu2 %816 }
 0x258   : > { %v818_v23 = vsub.f32 %v2108_v42, %v817_v21 }
 0x25a   : > { %v1521_v47 = vpop.eup %1520  ;;  %v819_v25 = vmul.f32 1.442695, %v818_v23 }
 0x25b   : > { %v546_v48 = vmul.f32 %v1521_v47, %v544_v45  ;;  %vm551_vm4 = vweird.f32 %v1521_v47 }
 0x25c   : > { %vm552_vm6 = vmor %vm550_vm5, %vm551_vm4  ;;  %1524 = vpow2.f32 %v819_v25 }
 0x25d   : > { %v547_v49 = vsub.f32 1.0, %v546_v48 }
 0x25f   : > { %v548_v51 = vmul.f32 %v1521_v47, %v547_v49 }
 0x261   : > { %v549_v53 = vadd.f32 %v1521_v47, %v548_v51 }
 0x263   : > { %v553_v56 = vsel %vm552_vm6, %v1521_v47, %v549_v53 }
 0x264   : > { %v558_v57 = vsel %vm555_vm7, %v557_v55, %v553_v56 }
 0x265   : > { %v559_v58 = vmul.f32 %v1519_v39, %v558_v57 }
 0x266   : > { %v726_v59 = vpop.permute.xlu0 %725 }
 0x267   : > { %v731_v60 = vsel %vm515_vm1, %v726_v59, 0  ;;  %v560_v61 = vpack.c.bf16 %v559_v58, %v559_v58 }
 0x269   : > { %1356 = vmatmul.msk.bf16.vlgmr.msra.gmra.mxu3 %vm535_vm3, %v560_v61 }
 0x26a   : > { %740 = vmatpush.bf16.xpose.msra.mxu3 %v731_v60 }
 0x26e   : > { %v933_v63 = vpop.permute.xlu0 %932 }
 0x26f   : > { %v938_v0 = vsel %vm515_vm1, %v933_v63, 0 }
 0x270   : > { %947 = vmatpush.bf16.xpose.msrb.mxu1 %v938_v0 }
 0x276   : > { %v1000_v5 = vpop.permute.xlu0 %999 }
 0x277   : > { %1367 = vmatmul.msk.bf16.vlgmr.msrb.gmra.mxu1 %vm515_vm1, %v931_v1 }
 0x279   : > { %1357 = vmatmul.msk.bf16.vlgmr.msrb.gmra.mxu3 %vm515_vm1, %v2091_v15  ;;  %v2136_v15 = vpop.eup %1522 }
 0x27a   : > { %878 = vmatpush.bf16.xpose.msrb.mxu3 %v869_v2  ;;  %v683_v20 = vsel %vm535_vm3, %v2136_v15, 0.0  ;;  %v2145_v29 = vpop.eup %1524 }
 0x27b   : > { %v821_v31 = vsel %vm535_vm3, %v2145_v29, 0.0 }
 0x289   : > { %1361 = vmatmul.msk.bf16.vlgmr.msra.gmra.mxu3 %vm515_vm1, %v724_v46 }
 0x28a   : > { %1016 = vmatpush.bf16.xpose.msra.mxu3 %v1007_v4 }
 0x299   : > { %1365 = vmatmul.msk.bf16.vlgmr.msrb.gmra.mxu3 %vm515_vm1, %v862_v62 }
 0x2a9   : > { %1369 = vmatmul.msk.bf16.vlgmr.msra.gmra.mxu3 %vm515_vm1, %v1000_v5 }
 0x2ec   : > { %v2129_v7 = vpop.f32.mrf.mxu3 }
 0x2f4   : > { %v582_v10 = vpop.f32.mrf.mxu3  ;;  %v949_v12 = vpop.f32.mrf.mxu1 }
 0x2f5   : > { %v2132_v13 = vadd.f32 %v949_v12, %v2098_v24 }
 0x2f7   : > { %v953_v14 = vsel %vm535_vm3, %v2132_v13, -inf }
 0x2f8   : > { %954 = vmax.xlane.f32.xlu0 %v953_v14 }
 0x2fc   : > { %v604_v16 = vpop.f32.mrf.mxu3  ;;  %v951_v17 = vpop.f32.mrf.mxu1 }
 0x2fd   : > { %v605_v18 = vadd.f32 %v604_v16, %v2098_v24 }
 0x2ff   : > { %v608_v19 = vsel %vm535_vm3, %v605_v18, -inf }
 0x300   : > { %609 = vmax.xlane.f32.xlu1 %v608_v19  ;;  %684 = vadd.xlane.f32.xlu0 %v683_v20 }
 0x304   : > { %v606_v22 = vpop.f32.mrf.mxu3 }
 0x30c   : > { %v742_v26 = vpop.f32.mrf.mxu3 }
 0x30d   : > { %v743_v27 = vadd.f32 %v742_v26, %v2098_v24 }
 0x30f   : > { %v746_v28 = vsel %vm535_vm3, %v743_v27, -inf }
 0x310   : > { %747 = vmax.xlane.f32.xlu0 %v746_v28 }
 0x314   : > { %v744_v30 = vpop.f32.mrf.mxu3 }
 0x318   : > { %822 = vadd.xlane.f32.xlu0 %v821_v31 }
 0x31c   : > { %v880_v32 = vpop.f32.mrf.mxu3 }
 0x31d   : > { %v881_v33 = vadd.f32 %v880_v32, %v2098_v24 }
 0x31f   : > { %v884_v34 = vsel %vm535_vm3, %v881_v33, -inf }
 0x320   : > { %885 = vmax.xlane.f32.xlu1 %v884_v34 }
 0x324   : > { %v882_v35 = vpop.f32.mrf.mxu3 }
 0x32c   : > { %771 = vrot.lane.b32.xlu0 %v2070_v11, %s1839_s14  ;;  %v1018_v36 = vpop.f32.mrf.mxu3  ;;  %s1160_s14 = sshll.u32 %s440_s15, 4  ;;  %s1161_s14 = int_to_ptr.vmem [resolvable:$true] %s1160_s14 }
 0x32d   : > { %v2153_v37 = vadd.f32 %v1018_v36, %v2098_v24 }
 0x32f   : > { %v1022_v38 = vsel %vm535_vm3, %v2153_v37, -inf }
 0x330   : > { %1023 = vmax.xlane.f32.xlu2 %v1022_v38 }
 0x334   : > { %v1020_v39 = vpop.f32.mrf.mxu3 }
 0x348   : > { %702 = vrot.lane.b32.xlu2 %v2070_v11, %s1840_s3  ;;  %s1162_s3 = sshll.u32 %s1158_s16, 4  ;;  %s1163_s3 = int_to_ptr.hbm [resolvable:$true] %s1162_s3 }
 0x349   : > { %s1744_s27 = sshra.s32 %s1163_s3, 4  ;;  %s1745_s27 = int_to_ptr.hbm [resolvable:$true] %s1744_s27 }
 0x34a   : > { %p1751_p6 = scmp.lt.s32.totalorder %s1745_s27, %s2260_s7 }
 0x36b   : > { %v955_v40 = vpop.xlane.xlu0 %954 }
 0x36c   : > { %v956_v8 = vsub.f32 %v2132_v13, %v955_v40 }
 0x36e   : > { %v957_v9 = vmul.f32 1.442695, %v956_v8 }
 0x373   : > { %v610_v41 = vpop.xlane.xlu1 %609  ;;  %v685_v44 = vpop.xlane.xlu0 %684 }
 0x374   : > { %v611_v42 = vsub.f32 %v605_v18, %v610_v41  ;;  %v697_v61 = vand.u32 2147483648, %v685_v44  ;;  %vm691_vm9 = vweird.f32 %v685_v44  ;;  %v695_v62 = vand.u32 2147483647, %v685_v44 }
 0x376   : > { %v612_v43 = vmul.f32 1.442695, %v611_v42  ;;  %v698_v1 = vor.u32 1.1754944e-38, %v697_v61  ;;  %vm696_vm11 = vcmp.eq.f32.partialorder %v695_v62, 8.507059e+37 }
 0x378   : > { %1526 = vpow2.f32 %v612_v43 }
 0x37e   : > { %v2158_v45 = vpop.eup %1526 }
 0x37f   : > { %v614_v24 = vsel %vm535_vm3, %v2158_v45, 0.0 }
 0x380   : > { %615 = vadd.xlane.f32.xlu1 %v614_v24 }
 0x383   : > { %v748_v46 = vpop.xlane.xlu0 %747 }
 0x384   : > { %v749_v47 = vsub.f32 %v743_v27, %v748_v46 }
 0x386   : > { %v750_v48 = vmul.f32 1.442695, %v749_v47 }
 0x388   : > { %1528 = vpow2.f32 %v750_v48 }
 0x389   : > { %1530 = vrcp.f32 %v685_v44 }
 0x38b   : > { %v823_v17 = vpop.xlane.xlu0 %822 }
 0x38c   : > { %vm829_vm14 = vweird.f32 %v823_v17  ;;  %v835_v28 = vand.u32 2147483648, %v823_v17  ;;  %v833_v32 = vand.u32 2147483647, %v823_v17 }
 0x38e   : > { %v2162_v49 = vpop.eup %1528  ;;  %vm834_vm6 = vcmp.eq.f32.partialorder %v833_v32, 8.507059e+37 }
 0x38f   : > { %v752_v50 = vsel %vm535_vm3, %v2162_v49, 0.0  ;;  %v1531_v51 = vpop.eup %1530 }
 0x390   : > { %753 = vadd.xlane.f32.xlu2 %v752_v50  ;;  %v687_v53 = vmul.f32 %v1531_v51, %v685_v44  ;;  %vm692_vm8 = vweird.f32 %v1531_v51 }
 0x391   : > { %vm693_vm10 = vmor %vm691_vm9, %vm692_vm8 }
 0x392   : > { %v688_v56 = vsub.f32 1.0, %v687_v53 }
 0x393   : > { %v886_v52 = vpop.xlane.xlu1 %885 }
 0x394   : > { %v887_v54 = vsub.f32 %v881_v33, %v886_v52  ;;  %v689_v57 = vmul.f32 %v1531_v51, %v688_v56 }
 0x396   : > { %v888_v55 = vmul.f32 1.442695, %v887_v54  ;;  %v690_v60 = vadd.f32 %v1531_v51, %v689_v57 }
 0x398   : > { %1532 = vpow2.f32 %v888_v55  ;;  %v694_v0 = vsel %vm693_vm10, %v1531_v51, %v690_v60 }
 0x399   : > { %633 = vrot.lane.b32.xlu1 %v2070_v11, %s1841_s1  ;;  %v699_v2 = vsel %vm696_vm11, %v698_v1, %v694_v0  ;;  %1534 = vpow2.f32 %v957_v9  ;;  %s1147_s1 = scalar_lea.sflag [#allocation4], %s2038_s10 }
 0x39a   : > { %v700_v3 = vmul.f32 %v2136_v15, %v699_v2 }
 0x39c   : > { %v701_v6 = vpack.c.bf16 %v700_v3, %v700_v3 }
 0x39e   : > { %v2167_v58 = vpop.eup %1532  ;;  %v772_v43 = vpop.permute.xlu0 %771 }
 0x39f   : > { %v890_v59 = vsel %vm535_vm3, %v2167_v58, 0.0  ;;  %v2178_v10 = vpop.eup %1534  ;;  %v777_v51 = vsel %vm567_vm2, %v772_v43, 0 }
 0x3a0   : > { %891 = vadd.xlane.f32.xlu0 %v890_v59  ;;  %v959_v14 = vsel %vm535_vm3, %v2178_v10, 0.0 }
 0x3a3   : > { %v1024_v63 = vpop.xlane.xlu2 %1023 }
 0x3a4   : > { %v1025_v12 = vsub.f32 %v2153_v37, %v1024_v63  ;;  %v836_v37 = vor.u32 1.1754944e-38, %v835_v28 }
 0x3a6   : > { %v1026_v15 = vmul.f32 1.442695, %v1025_v12 }
 0x3a8   : > { %840 = vrot.lane.b32.xlu2 %v2070_v11, %s1842_s19  ;;  %1536 = vpow2.f32 %v1026_v15  ;;  %s1746_s19 = scalar_lea.hbm %s1745_s27, 8 }
 0x3a9   : > { %1538 = vrcp.f32 %v823_v17  ;;  %p1747_p1 = scmp.ne.s32.totalorder %s1745_s27, %s1746_s19  ;;  %p1752_p8 = scmp.lt.s32.totalorder %s1750_s4, %s1746_s19 }
 0x3ab   : > { %v703_v4 = vpop.permute.xlu2 %702  ;;  %p1748_p3 = pnand %p1747_p1, %p1973_p4  ;;  %p1753_p10 = por %p1752_p8, %p1751_p6 }
 0x3ac   : > { %v708_v5 = vsel %vm567_vm2, %v703_v4, 0 }
 0x3ad   : > { %717 = vmatpush.bf16.msrb.mxu2 %v708_v5  ;;  %p1749_p5 = pneg %p1748_p3 }
 0x3ae   : > { %v2184_v13 = vpop.eup %1536 }
 0x3af   : > { %v1028_v16 = vsel %vm535_vm3, %v2184_v13, 0.0  ;;  %v1539_v18 = vpop.eup %1538  ;;  %p1754_p11 = pnand %p1753_p10, %p1749_p5 }
 0x3b0   : > { %1360 = vmatmul.msk.bf16.vlgmr.msrb.gmra.mxu2 %vm535_vm3, %v701_v6  ;;  %v825_v20 = vmul.f32 %v1539_v18, %v823_v17  ;;  %vm830_vm12 = vweird.f32 %v1539_v18 }
 0x3b1   : > { %vm831_vm15 = vmor %vm829_vm14, %vm830_vm12 }
 0x3b2   : > { %v826_v21 = vsub.f32 1.0, %v825_v20 }
 0x3b4   : > { %909 = vrot.lane.b32.xlu0 %v2070_v11, %s1843_s17  ;;  %v827_v25 = vmul.f32 %v1539_v18, %v826_v21 }
 0x3b6   : > { %v828_v27 = vadd.f32 %v1539_v18, %v827_v25 }
 0x3b8   : > { %v832_v35 = vsel %vm831_vm15, %v1539_v18, %v828_v27 }
 0x3b9   : > { %v837_v39 = vsel %vm834_vm6, %v836_v37, %v832_v35 }
 0x3ba   : > { %v838_v42 = vmul.f32 %v2145_v29, %v837_v39 }
 0x3bc   : > { %978 = vrot.lane.b32.xlu0 %v2070_v11, %s1844_s8  ;;  %v839_v54 = vpack.c.bf16 %v838_v42, %v838_v42 }
 0x3c3   : > { %960 = vadd.xlane.f32.xlu1 %v959_v14 }
 0x3c4   : > { %1047 = vrot.lane.b32.xlu0 %v2070_v11, %s1845_s5 }
 0x3d1   : > { %1029 = vadd.xlane.f32.xlu2 %v1028_v16 }
 0x3f3   : > { %v616_v19 = vpop.xlane.xlu1 %615 }
 0x3f4   : > { %1540 = vrcp.f32 %v616_v19  ;;  %v628_v31 = vand.u32 2147483648, %v616_v19  ;;  %vm622_vm4 = vweird.f32 %v616_v19  ;;  %v626_v33 = vand.u32 2147483647, %v616_v19 }
 0x3f6   : > { %v629_v38 = vor.u32 1.1754944e-38, %v628_v31  ;;  %vm627_vm7 = vcmp.eq.f32.partialorder %v626_v33, 8.507059e+37 }
 0x3fa   : > { %v1541_v22 = vpop.eup %1540 }
 0x3fb   : > { %v618_v23 = vmul.f32 %v1541_v22, %v616_v19  ;;  %vm623_vm13 = vweird.f32 %v1541_v22 }
 0x3fc   : > { %vm624_vm5 = vmor %vm622_vm4, %vm623_vm13 }
 0x3fd   : > { %v619_v26 = vsub.f32 1.0, %v618_v23 }
 0x3ff   : > { %v620_v11 = vmul.f32 %v1541_v22, %v619_v26 }
 0x401   : > { %v621_v30 = vadd.f32 %v1541_v22, %v620_v11 }
 0x403   : > { %v754_v34 = vpop.xlane.xlu2 %753  ;;  %v625_v36 = vsel %vm624_vm5, %v1541_v22, %v621_v30 }
 0x404   : > { %1542 = vrcp.f32 %v754_v34  ;;  %v630_v40 = vsel %vm627_vm7, %v629_v38, %v625_v36  ;;  %vm760_vm9 = vweird.f32 %v754_v34  ;;  %v764_v56 = vand.u32 2147483647, %v754_v34 }
 0x405   : > { %v631_v44 = vmul.f32 %v2158_v45, %v630_v40  ;;  %v766_v45 = vand.u32 2147483648, %v754_v34 }
 0x406   : > { %vm765_vm11 = vcmp.eq.f32.partialorder %v764_v56, 8.507059e+37 }
 0x407   : > { %v632_v53 = vpack.c.bf16 %v631_v44, %v631_v44  ;;  %v767_v60 = vor.u32 1.1754944e-38, %v766_v45 }
 0x40a   : > { %v1543_v41 = vpop.eup %1542 }
 0x40b   : > { %v756_v24 = vmul.f32 %v1543_v41, %v754_v34  ;;  %v634_v46 = vpop.permute.xlu1 %633  ;;  %v841_v47 = vpop.permute.xlu2 %840  ;;  %vm761_vm8 = vweird.f32 %v1543_v41 }
 0x40c   : > { %v846_v48 = vsel %vm567_vm2, %v841_v47, 0  ;;  %v639_v50 = vsel %vm567_vm2, %v634_v46, 0  ;;  %vm762_vm10 = vmor %vm760_vm9, %vm761_vm8 }
 0x40d   : > { %v757_v52 = vsub.f32 1.0, %v756_v24  ;;  %648 = vmatpush.bf16.msrb.mxu0 %v639_v50  ;;  %855 = vmatpush.bf16.msra.mxu2 %v846_v48 }
 0x40f   : > { %v758_v55 = vmul.f32 %v1543_v41, %v757_v52 }
 0x410   : > { %1358 = vmatmul.msk.bf16.vlgmr.msrb.gmra.mxu0 %vm535_vm3, %v632_v53  ;;  %1364 = vmatmul.msk.bf16.vlgmr.msra.gmra.mxu2 %vm535_vm3, %v839_v54 }
 0x411   : > { %786 = vmatpush.bf16.msra.mxu0 %v777_v51  ;;  %v759_v29 = vadd.f32 %v1543_v41, %v758_v55 }
 0x413   : > { %v892_v57 = vpop.xlane.xlu0 %891  ;;  %v763_v59 = vsel %vm762_vm10, %v1543_v41, %v759_v29 }
 0x414   : > { %1544 = vrcp.f32 %v892_v57  ;;  %v768_v61 = vsel %vm765_vm11, %v767_v60, %v763_v59  ;;  %v904_v5 = vand.u32 2147483648, %v892_v57  ;;  %vm898_vm13 = vweird.f32 %v892_v57  ;;  %v1389_v59 = vld [vmem:[#allocation11 + $0x8] sm:$0xff]  ;;  %v1388_v60 = vld [vmem:[#allocation11] sm:$0xff] }
 0x415   : > { %v769_v63 = vmul.f32 %v2162_v49, %v768_v61  ;;  %v902_v6 = vand.u32 2147483647, %v892_v57  ;;  %1138 = vmatpush.bf16.msra.mxu1 %v1389_v59  ;;  %vm1098_vm11 = vcmask 97280  }
 0x416   : > { %v905_v9 = vor.u32 1.1754944e-38, %v904_v5 }
 0x417   : > { %v770_v2 = vpack.c.bf16 %v769_v63, %v769_v63  ;;  %vm903_vm15 = vcmp.eq.f32.partialorder %v902_v6, 8.507059e+37 }
 0x419   : > { %1139 = vmatpush.bf16.msra.mxu1 %v1388_v60 }
 0x41a   : > { %v1545_v62 = vpop.eup %1544 }
 0x41b   : > { %v894_v0 = vmul.f32 %v1545_v62, %v892_v57  ;;  %vm899_vm12 = vweird.f32 %v1545_v62 }
 0x41c   : > { %vm900_vm14 = vmor %vm898_vm13, %vm899_vm12  ;;  %vm1100_vm12 = vcmask 130048   ;;  %vm1102_vm13 = vcmask 162816  }
 0x41d   : > { %v895_v1 = vsub.f32 1.0, %v894_v0 }
 0x41f   : > { %v896_v3 = vmul.f32 %v1545_v62, %v895_v1 }
 0x420   : > { %1362 = vmatmul.msk.bf16.vlgmr.msra.gmra.mxu0 %vm535_vm3, %v770_v2 }
 0x421   : > { %v897_v4 = vadd.f32 %v1545_v62, %v896_v3 }
 0x423   : > { %v901_v8 = vsel %vm900_vm14, %v1545_v62, %v897_v4  ;;  %vm1104_vm14 = vcmask 195584  }
 0x424   : > { %v906_v14 = vsel %vm903_vm15, %v905_v9, %v901_v8  ;;  %vm1106_vm15 = vcmask 228352  }
 0x425   : > { %v907_v49 = vmul.f32 %v2167_v58, %v906_v14 }
 0x426   : > { %v910_v12 = vpop.permute.xlu0 %909 }
 0x427   : > { %v915_v15 = vsel %vm567_vm2, %v910_v12, 0  ;;  %v908_v17 = vpack.c.bf16 %v907_v49, %v907_v49 }
 0x428   : > { %924 = vmatpush.bf16.msrb.mxu0 %v915_v15  ;;  %v1517_v15 = vld [vmem:[%s2259_s6] ss:$0 sm:$0xff] }
 0x42e   : > { %v979_v16 = vpop.permute.xlu0 %978 }
 0x42f   : > { %v984_v18 = vsel %vm567_vm2, %v979_v16, 0 }
 0x430   : > { %1366 = vmatmul.msk.bf16.vlgmr.msrb.gmra.mxu0 %vm535_vm3, %v908_v17  ;;  %993 = vmatpush.bf16.msrb.mxu2 %v984_v18 }
 0x433   : > { %v719_v19 = vpop.f32.mrf.mxu2 }
 0x434   : > { %1073 = vrot.lane.b32.xlu1 %v719_v19, %s1846_s12 }
 0x436   : > { %v961_v20 = vpop.xlane.xlu1 %960  ;;  %v1048_v21 = vpop.permute.xlu0 %1047 }
 0x437   : > { %1546 = vrcp.f32 %v961_v20  ;;  %v1053_v22 = vsel %vm567_vm2, %v1048_v21, 0  ;;  %v973_v11 = vand.u32 2147483648, %v961_v20  ;;  %v971_v28 = vand.u32 2147483647, %v961_v20 }
 0x438   : > { %1062 = vmatpush.bf16.msra.mxu0 %v1053_v22  ;;  %vm967_vm5 = vweird.f32 %v961_v20 }
 0x439   : > { %v974_v32 = vor.u32 1.1754944e-38, %v973_v11  ;;  %vm972_vm7 = vcmp.eq.f32.partialorder %v971_v28, 8.507059e+37 }
 0x43b   : > { %v721_v23 = vpop.f32.mrf.mxu2 }
 0x43d   : > { %v1547_v25 = vpop.eup %1546 }
 0x43e   : > { %v963_v26 = vmul.f32 %v1547_v25, %v961_v20  ;;  %vm968_vm4 = vweird.f32 %v1547_v25 }
 0x43f   : > { %vm969_vm6 = vmor %vm967_vm5, %vm968_vm4 }
 0x440   : > { %v964_v58 = vsub.f32 1.0, %v963_v26 }
 0x442   : > { %v965_v27 = vmul.f32 %v1547_v25, %v964_v58 }
 0x444   : > { %v966_v30 = vadd.f32 %v1547_v25, %v965_v27  ;;  %v1030_v31 = vpop.xlane.xlu2 %1029 }
 0x445   : > { %1548 = vrcp.f32 %v1030_v31  ;;  %v1042_v40 = vand.u32 2147483648, %v1030_v31  ;;  %v1040_v42 = vand.u32 2147483647, %v1030_v31  ;;  %vm1036_vm8 = vweird.f32 %v1030_v31 }
 0x446   : > { %v970_v33 = vsel %vm969_vm6, %v1547_v25, %v966_v30 }
 0x447   : > { %v975_v34 = vsel %vm972_vm7, %v974_v32, %v970_v33  ;;  %v1043_v44 = vor.u32 1.1754944e-38, %v1042_v40  ;;  %vm1041_vm10 = vcmp.eq.f32.partialorder %v1040_v42, 8.507059e+37 }
 0x448   : > { %v976_v35 = vmul.f32 %v2178_v10, %v975_v34 }
 0x44a   : > { %v977_v36 = vpack.c.bf16 %v976_v35, %v976_v35 }
 0x44b   : > { %v1549_v37 = vpop.eup %1548 }
 0x44c   : > { %v1032_v38 = vmul.f32 %v1549_v37, %v1030_v31  ;;  %1368 = vmatmul.msk.bf16.vlgmr.msrb.gmra.mxu2 %vm535_vm3, %v977_v36  ;;  %vm1037_vm2 = vweird.f32 %v1549_v37 }
 0x44d   : > { %vm1038_vm9 = vmor %vm1036_vm8, %vm1037_vm2 }
 0x44e   : > { %v1033_v39 = vsub.f32 1.0, %v1032_v38 }
 0x450   : > { %v1034_v41 = vmul.f32 %v1549_v37, %v1033_v39 }
 0x452   : > { %v1035_v43 = vadd.f32 %v1549_v37, %v1034_v41 }
 0x454   : > { %v1039_v24 = vsel %vm1038_vm9, %v1549_v37, %v1035_v43 }
 0x455   : > { %v1044_v46 = vsel %vm1041_vm10, %v1043_v44, %v1039_v24 }
 0x456   : > { %v1045_v47 = vmul.f32 %v2184_v13, %v1044_v46 }
 0x458   : > { %v1046_v10 = vpack.c.bf16 %v1045_v47, %v1045_v47 }
 0x45a   : > { %1370 = vmatmul.msk.bf16.vlgmr.msra.gmra.mxu0 %vm535_vm3, %v1046_v10 }
 0x48d   : > { %v650_v48 = vpop.f32.mrf.mxu0 }
 0x493   : > { %v857_v50 = vpop.f32.mrf.mxu2 }
 0x494   : > { %1081 = vrot.lane.b32.xlu0 %v857_v50, %s1847_s26 }
 0x495   : > { %v652_v51 = vpop.f32.mrf.mxu0 }
 0x49b   : > { %v859_v52 = vpop.f32.mrf.mxu2 }
 0x49c   : > { %1069 = vrot.lane.b32.xlu0 %v650_v48, %s1848_s11 }
 0x49d   : > { %v788_v53 = vpop.f32.mrf.mxu0 }
 0x4a4   : > { %1077 = vrot.lane.b32.xlu0 %v788_v53, %s1849_s13 }
 0x4a5   : > { %v790_v54 = vpop.f32.mrf.mxu0 }
 0x4a6   : > { %v1074_v1 = vpop.permute.xlu1 %1073 }
 0x4ad   : > { %v926_v55 = vpop.f32.mrf.mxu0 }
 0x4ae   : > { %1085 = vrot.lane.b32.xlu2 %v926_v55, %s1850_s22 }
 0x4b5   : > { %v928_v29 = vpop.f32.mrf.mxu0 }
 0x4cf   : > { %v995_v13 = vpop.f32.mrf.mxu2 }
 0x4d0   : > { %1089 = vrot.lane.b32.xlu0 %v995_v13, %s1851_s29 }
 0x4d7   : > { %v997_v45 = vpop.f32.mrf.mxu2  ;;  %v1064_v56 = vpop.f32.mrf.mxu0 }
 0x4d8   : > { %1093 = vrot.lane.b32.xlu1 %v1064_v56, %s1852_s30 }
 0x4df   : > { %v1066_v57 = vpop.f32.mrf.mxu0 }
 0x506   : > { %v1082_v61 = vpop.permute.xlu0 %1081 }
 0x508   : > { %v1086_v6 = vpop.permute.xlu2 %1085 }
 0x50e   : > { %v1070_v62 = vpop.permute.xlu0 %1069 }
 0x50f   : > { %v1096_v63 = vsel %vm515_vm1, %v2129_v7, %v1070_v62 }
 0x510   : > { %v1097_v2 = vsel %vm535_vm3, %v1096_v63, %v1074_v1 }
 0x516   : > { %v1078_v0 = vpop.permute.xlu0 %1077 }
 0x517   : > { %v1099_v3 = vsel %vm1098_vm11, %v1097_v2, %v1078_v0 }
 0x518   : > { %v1101_v4 = vsel %vm1100_vm12, %v1099_v3, %v1082_v61 }
 0x519   : > { %v1103_v8 = vsel %vm1102_vm13, %v1101_v4, %v1086_v6 }
 0x542   : > { %v1090_v5 = vpop.permute.xlu0 %1089 }
 0x543   : > { %v1105_v9 = vsel %vm1104_vm14, %v1103_v8, %v1090_v5 }
 0x54a   : > { %v1094_v12 = vpop.permute.xlu1 %1093 }
 0x54b   : > { %v1107_v7 = vsel %vm1106_vm15, %v1105_v9, %v1094_v12 }
 0x54c   : > { %v1108_v14 = vpack.c.bf16 %v1107_v7, %v1107_v7 }
 0x54e   : > { %1379 = vmatmul.msk.bf16.vlgmr.msra.gmra.mxu1 %vm464_vm0, %v1108_v14 }
 0x5cb   : > { %v1141_v49 = vpop.f32.mrf.mxu1 }
 0x5cc   : > { %v1142_v16 = vadd.f32 %v1517_v15, %v1141_v49 }
 0x5ce   : > { %1145 = vst.msk [vmem:[%s440_s15] sm:$0xff] %vm464_vm0, %v1142_v16 }
 0x5cf   : > { %1757 = shalt.err (!%p1754_p11)
}
 0x5d0   : > { %1408 = dma.vmem_to_hbm [thread:$0]  (%p1973_p4), %s1161_s14, 128, %s1163_s3, %s1147_s1  }
 0x5d3   : > { %v1143_v17 = vpop.f32.mrf.mxu1 }
 0x5d4 PF: > { %s2294_s10 = sld [smem:[#allocation19_spill]] }
 0x5d5   : > { %s2296_s11 = sld [smem:[#allocation21_spill]] }
 0x5da   : > { %s1174_s13 = sand.u32 1, %s2294_s10  }
 0x5db   : > { %p2297_p12 = scmp.ge.s32.totalorder %s2296_s11, 2  ;;  %s1175_s22 = scalar_lea.sflag [#allocation4], %s1174_s13 }
 0x5dd   : > { %p1431_p13 = pnand %p2297_p12, %p1981_p9 }
 0x5df   : > { %p1432_p0 = pneg %p1431_p13 }
 0x5e1   : > { %1799 = dma.done.wait (%p1432_p0), %s1175_s22, 128  }
 0x5e2   : > { %1801 = vsyncadd (%p1432_p0), %s1175_s22, 4294967168  ;;  %s28_s29 = sadd.s32 1, %s2296_s11   ;;  %s2298_s30 = sld [smem:[#allocation20_spill]] }
 0x5e3   : > { %p25_p2 = scmp.ge.s32.totalorder %s28_s29, 4   ;;  %s2299_s26 = sld [smem:[#allocation23_spill]] }
 0x5e4   : > { %s2300_s23 = sld [smem:[#allocation22_spill]]  ;;  %s2301_s24 = smov %s1808_s25 }
 0x5e5   : > { %s2303_s27 = smov %s1820_s28 }
 0x5e6   :  { %27 = sbr.rel (!%p25_p2) target bundleno = 15 (0xf), region = 129 }
 0x5e8   : > { %s2302_s25 = smov %s2298_s30 }
 0x5ea   : > { %s2304_s28 = smov %s2300_s23 }
 0x5eb   :  { %1181 = vsyncpa [#allocation3], 1 }
 0x5ec   :  { %1183 = vsyncpa [#allocation3 + $0x1], 1 }
 0x5ed   :  { %1184 = vsyncpa [#allocation6], 1 }
 0x5ee   :  { %1186 = vsyncpa [#allocation6 + $0x1], 1 }
 0x5ef   :  { %1187 = vsyncpa [#allocation9], 1 }
 0x5f0   :  { %1188 = vsyncpa [#allocation12], 1 }
 0x5f1   :  { %1189 = vsyncpa [#allocation4], 1 }
 0x5f2   :  { %1191 = vsyncpa [#allocation4 + $0x1], 1 }

</bundles_post_ra>
